<compile_context>
chip_gen: v7x
topology: tpu7x:2x2x1
jax: 0.10.0
libtpu: 0.0.40
codegen_flags: <defaults>
</compile_context>

<pallas_src>
import jax
import jax.numpy as jnp
from jax.experimental import pallas as pl
from jax.experimental.pallas import tpu as pltpu

_LANE = 128                      # vreg lane width (last-dim tile)
_MAX_BLOCK_M = 4096              # 4096 x 128 f32 = 2 MiB/buffer; in+out double-buffered ~= 8 MiB
_VMEM_LIMIT = 32 * 1024 * 1024   # raise v5e's 16 MiB scoped default; equals v6e/v7x default


def _linear_kernel(w_ref, b_ref, x_ref, o_ref):
    # w_ref, b_ref: (1,) scalars in SMEM. x_ref / o_ref: (block_m, 128) VMEM tiles.
    o_ref[...] = x_ref[...] * w_ref[0] + b_ref[0]


def linear_regression_forward(x: jax.Array, weight: jax.Array, bias: jax.Array) -> jax.Array:
    """x: (..., 1) (nn.Linear(1,1) input), weight: (1,1), bias: (1,) -> same shape as x."""
    orig_shape = x.shape
    dtype = x.dtype
    n = x.size

    # Lane-dense view of the N scalar features: (rows, 128).
    rows = max(1, pl.cdiv(n, _LANE))
    padded_n = rows * _LANE

    x_flat = x.reshape(-1)
    needs_pad = padded_n != n
    if needs_pad:
        # <= 127 padded elements; the junk lanes of the last row are discarded below and
        # never feed a reduction (pure elementwise kernel).
        x_slab = jnp.pad(x_flat, (0, padded_n - n)).reshape(rows, _LANE)
    else:
        # Fast path: contiguous reshape is a free bitcast -> no extra HBM pass.
        x_slab = x_flat.reshape(rows, _LANE)

    # Either a single block equal to the full array rows, or 4096-row tiles (multiple of 32,
    # so sublane packing is valid for any input dtype).  The final block may be ragged; Pallas
    # masks its out-of-bounds writes.
    block_m = rows if rows <= _MAX_BLOCK_M else _MAX_BLOCK_M
    grid = (pl.cdiv(rows, block_m),)

    # Scalar parameters for SMEM (casting 1-element arrays is free).  Note: for low-precision
    # inputs this computes in the input dtype (params quantized), matching the output dtype.
    w = weight.reshape(1).astype(dtype)
    b = bias.reshape(1).astype(dtype)

    compiler_params = pltpu.CompilerParams(
        dimension_semantics=("parallel",),      # shard the row-tile grid across TCs on v7x
        vmem_limit_bytes=_VMEM_LIMIT,
        # In the ragged case, let XLA fuse the pad producer into the Pallas input fetch
        # instead of materializing a padded copy of x in HBM.
        allow_input_fusion=[False, False, True] if needs_pad else None,
    )

    out_slab = pl.pallas_call(
        _linear_kernel,
        out_shape=jax.ShapeDtypeStruct((rows, _LANE), dtype),
        grid=grid,
        in_specs=[
            pl.BlockSpec(memory_space=pltpu.SMEM),             # weight scalar (loaded once)
            pl.BlockSpec(memory_space=pltpu.SMEM),             # bias scalar (loaded once)
            pl.BlockSpec((block_m, _LANE), lambda i: (i, 0)),  # x row-tile
        ],
        out_specs=pl.BlockSpec((block_m, _LANE), lambda i: (i, 0)),
        compiler_params=compiler_params,
    )(w, b, x_slab)

    if needs_pad:
        return out_slab.reshape(-1)[:n].reshape(orig_shape)
    return out_slab.reshape(orig_shape)


if __name__ == "__main__":
    key = jax.random.PRNGKey(0)
    k_x, k_w, k_b = jax.random.split(key, 3)

    # nn.Linear(1, 1)-shaped parameters (uniform ~ PyTorch's kaiming-uniform bound for fan_in=1).
    weight = jax.random.uniform(k_w, (1, 1), minval=-1.0, maxval=1.0, dtype=jnp.float32)
    bias = jax.random.uniform(k_b, (1,), minval=-1.0, maxval=1.0, dtype=jnp.float32)

    # Primary small example: batch of 8 scalar features (N=8, in_features=1).
    x = jax.random.normal(k_x, (8, 1), dtype=jnp.float32)
    out = jax.block_until_ready(linear_regression_forward(x, weight, bias))
    ref = x @ weight.T + bias
    assert out.shape == x.shape
    assert jnp.allclose(out, ref, atol=1e-6, rtol=1e-6)

    # Fast path: n divisible by 128 -> no pad, no output slice.
    x_even = jax.random.normal(k_x, (256, 1), dtype=jnp.float32)
    out_even = jax.block_until_ready(linear_regression_forward(x_even, weight, bias))
    assert out_even.shape == x_even.shape
    assert jnp.allclose(out_even, x_even @ weight.T + bias, atol=1e-6, rtol=1e-6)

    # Ragged path: exercises grid > 1, a partial final block, and the tiny (<128-elem) pad.
    x_big = jax.random.normal(k_x, (2 * _MAX_BLOCK_M * _LANE + 5, 1), dtype=jnp.float32)
    out_big = jax.block_until_ready(linear_regression_forward(x_big, weight, bias))
    ref_big = x_big @ weight.T + bias
    assert out_big.shape == x_big.shape
    assert jnp.allclose(out_big, ref_big, atol=1e-6, rtol=1e-6)

    print("KERNEL_OK")
</pallas_src>

<mosaic_0001>
module attributes {stable_mosaic.version = 11 : i64} {
  func.func @_linear_kernel(%arg0: i32, %arg1: memref<1xf32, #tpu.memory_space<smem>>, %arg2: memref<1xf32, #tpu.memory_space<smem>>, %arg3: memref<1x128xf32, #tpu.memory_space<vmem>>, %arg4: memref<1x128xf32, #tpu.memory_space<vmem>>) attributes {dimension_semantics = [#tpu.dimension_semantics<parallel>], iteration_bounds = array<i64: 1>, scalar_prefetch = 0 : i64, scratch_operands = 0 : i64, tpu.core_type = #tpu.core_type<tc>, window_params = [{transform_indices = @transform_0, window_bounds = array<i64: 1>}, {transform_indices = @transform_1, window_bounds = array<i64: 1>}, {transform_indices = @transform_2, window_bounds = array<i64: 1, 128>}, {transform_indices = @transform_3, window_bounds = array<i64: 1, 128>}]} {
    %c0 = arith.constant 0 : index
    %c0_0 = arith.constant 0 : index
    %0 = vector.load %arg3[%c0, %c0_0] : memref<1x128xf32, #tpu.memory_space<vmem>>, vector<1x128xf32>
    %c0_1 = arith.constant 0 : index
    %1 = memref.load %arg1[%c0_1] : memref<1xf32, #tpu.memory_space<smem>>
    %2 = vector.broadcast %1 : f32 to vector<1x128xf32>
    %3 = arith.mulf %0, %2 : vector<1x128xf32>
    %c0_2 = arith.constant 0 : index
    %4 = memref.load %arg2[%c0_2] : memref<1xf32, #tpu.memory_space<smem>>
    %5 = vector.broadcast %4 : f32 to vector<1x128xf32>
    %6 = arith.addf %3, %5 : vector<1x128xf32>
    %c0_3 = arith.constant 0 : index
    %c0_4 = arith.constant 0 : index
    %7 = vector.load %arg4[%c0_3, %c0_4] : memref<1x128xf32, #tpu.memory_space<vmem>>, vector<1x128xf32>
    tpu.vector_store %arg4[%c0_3, %c0_4], %6 {strides = array<i32>} : memref<1x128xf32, #tpu.memory_space<vmem>>, vector<1x128xf32>,
    return
  }
  func.func @transform_0(%arg0: i32) -> i32 {
    %c0_i32 = arith.constant 0 : i32
    %c0_i32_0 = arith.constant 0 : i32
    return %c0_i32 : i32
  }
  func.func @transform_1(%arg0: i32) -> i32 {
    %c0_i32 = arith.constant 0 : i32
    %c0_i32_0 = arith.constant 0 : i32
    return %c0_i32 : i32
  }
  func.func @transform_2(%arg0: i32) -> (i32, i32) {
    %c0_i32 = arith.constant 0 : i32
    %c0_i32_0 = arith.constant 0 : i32
    return %arg0, %c0_i32 : i32, i32
  }
  func.func @transform_3(%arg0: i32) -> (i32, i32) {
    %c0_i32 = arith.constant 0 : i32
    %c0_i32_0 = arith.constant 0 : i32
    return %arg0, %c0_i32 : i32, i32
  }
}

</mosaic_0001>

<bundles_post_ra>
// kernel: tpu_custom_call.1
= control target key start
LH: loop header
LB: loop body
LE: loop exit
PB: predicated region body
PF: predicated region fallthrough
CT: control target
= control target key end

     0   :  { %s106_s0 = inlined_call_operand.<no memory space> [shape: f32[1], index: 0, kind: input, shape index: {}]   ;;  %s107_s1 = inlined_call_operand.<no memory space> [shape: f32[1], index: 1, kind: input, shape index: {}]   ;;  %s108_s2 = inlined_call_operand.vmem [shape: f32[1,128], index: 2, kind: input, shape index: {}]   ;;  %s109_s3 = inlined_call_operand.hbm [shape: f32[1,128], index: 3, kind: output, shape index: {}]  }
   0x1   :  { %v17_v0 = vld [vmem:[%s108_s2] sm:$0x1]  ;;  %v19_v1 = vstv %s106_s0  ;;  %v22_v2 = vstv %s107_s1 }
   0x2   :  { %10 = vsyncpa [#allocation5], 0  ;;  %v20_v3 = vmul.f32 %v19_v1, %v17_v0  ;;  %s64_s18 = smov [#allocation4]  }
   0x3   :  { %s31_s19 = sshll.u32 %s64_s18, 4  ;;  %s32_s19 = int_to_ptr.vmem [resolvable:$true] %s31_s19 }
   0x4   :  { %v23_v4 = vadd.f32 %v22_v2, %v20_v3  ;;  %s40_s20 = scalar_lea.vmem %s32_s19, 16  ;;  %s44_s21 = scalar_lea.vmem %s32_s19, 32 }
   0x5   :  { %p41_p0 = scmp.ne.s32.totalorder %s32_s19, %s40_s20  ;;  %p45_p1 = scmp.lt.s32.totalorder %s32_s19, %s32_s19 }
   0x6   :  { %24 = vst [vmem:[#allocation4] sm:$0x1] %v23_v4  ;;  %p46_p2 = scmp.lt.s32.totalorder %s44_s21, %s40_s20 }
   0x8   :  { %p47_p3 = por %p46_p2, %p45_p1 }
   0xa   :  { %p48_p4 = pnand %p47_p3, %p41_p0 }
   0xc   :  { %51 = shalt.err (!%p48_p4)
}
   0xd   :  { %s52_s22 = scalar_lea.hbm %s109_s3, 16 }
   0xe   :  { %p53_p5 = scmp.ne.s32.totalorder %s109_s3, %s52_s22  ;;  %p56_p6 = scmp.lt.u32.totalorder %s52_s22, %s109_s3 }
  0x10   :  { %p58_p7 = pnand %p56_p6, %p53_p5 }
  0x12   :  { %61 = shalt.err (!%p58_p7)
}
  0x13   :  { %34 = dma.vmem_to_hbm [thread:$0]  %s32_s19, 16, %s109_s3, [#allocation5]  }
  0x14   :  { %62 = dma.done.wait [#allocation5], 16  }
  0x15   :  { %63 = vsyncadd [#allocation5], 4294967280 }
  0x16   :  { %38 = vsyncpa [#allocation5], 1 }

</bundles_post_ra>
